<compile_context>
chip_gen: v7x
topology: tpu7x:2x2x1
jax: 0.10.0
libtpu: 0.0.40
codegen_flags: <defaults>
</compile_context>

<pallas_src>
import functools
import math

import jax
import jax.numpy as jnp
from jax.experimental import pallas as pl
from jax.experimental.pallas import tpu as pltpu


# Preferred tile sizes (v6e/v7x friendly; all multiples of 128 on N/K).
_TM, _TN, _TK = 512, 512, 1536
_VMEM_LIMIT = 48 * 1024 * 1024   # < v7x 64 MiB physical; > default scoped limits


def _tile(dim, pref, align):
    """Largest tile <= pref that is a multiple of `align` and divides dim;
    falls back to the full dim (full-extent blocks are always legal)."""
    if dim <= pref:
        return dim
    t = (pref // align) * align
    while t >= align:
        if dim % t == 0:
            return t
        t -= align
    return dim


def _apply_act(y, act):
    if act == "gelu":
        # TODO(synk): exact erf-based GELU; tanh approximation (HF "gelu_new")
        # used for Mosaic-safe lowering.
        y = 0.5 * y * (1.0 + jnp.tanh(0.7978845608028654 *
                                      (y + 0.044715 * y * y * y)))
    elif act == "tanh":
        y = jnp.tanh(y)
    return y


# ----------------------------------------------------------------------------
# Tiled dense: y = act(x @ w + b)
#   - K-collapsed variant (no accumulator / pl.when) when tk == K
#   - K-tiled variant with f32 VMEM accumulator otherwise
# ----------------------------------------------------------------------------

def _dense_nok_kernel(x_ref, w_ref, b_ref, o_ref, *, act):
    y = jnp.dot(x_ref[...], w_ref[...], preferred_element_type=jnp.float32)
    o_ref[...] = _apply_act(y + b_ref[...], act).astype(o_ref.dtype)


def _dense_acc_kernel(x_ref, w_ref, b_ref, o_ref, acc_ref, *, act):
    @pl.when(pl.program_id(2) == 0)
    def _():
        acc_ref[...] = jnp.zeros_like(acc_ref)

    acc_ref[...] += jnp.dot(x_ref[...], w_ref[...],
                            preferred_element_type=jnp.float32)

    @pl.when(pl.program_id(2) == pl.num_programs(2) - 1)
    def _():
        o_ref[...] = _apply_act(acc_ref[...] + b_ref[...], act).astype(o_ref.dtype)


def dense(x, w, b, act="none", out_dtype=jnp.bfloat16):
    M, K = x.shape
    K2, N = w.shape
    assert K == K2
    tm = _tile(M, _TM, 16)          # 16-row align for bf16 sublane packing
    tn = _tile(N, _TN, 128)
    tk = _tile(K, _TK, 128)
    b2 = b.reshape(1, N).astype(jnp.float32)

    if tk == K:                      # K axis collapses: no accumulator needed
        return pl.pallas_call(
            functools.partial(_dense_nok_kernel, act=act),
            out_shape=jax.ShapeDtypeStruct((M, N), out_dtype),
            grid=(M // tm, N // tn),
            in_specs=[
                pl.BlockSpec((tm, K), lambda i, j: (i, 0)),
                pl.BlockSpec((K, tn), lambda i, j: (0, j)),
                pl.BlockSpec((1, tn), lambda i, j: (0, j)),
            ],
            out_specs=pl.BlockSpec((tm, tn), lambda i, j: (i, j)),
            compiler_params=pltpu.CompilerParams(
                dimension_semantics=("parallel", "parallel"),
                vmem_limit_bytes=_VMEM_LIMIT),
        )(x, w, b2)

    return pl.pallas_call(
        functools.partial(_dense_acc_kernel, act=act),
        out_shape=jax.ShapeDtypeStruct((M, N), out_dtype),
        grid=(M // tm, N // tn, K // tk),
        in_specs=[
            pl.BlockSpec((tm, tk), lambda i, j, k: (i, k)),
            pl.BlockSpec((tk, tn), lambda i, j, k: (k, j)),
            pl.BlockSpec((1, tn), lambda i, j, k: (0, j)),
        ],
        out_specs=pl.BlockSpec((tm, tn), lambda i, j, k: (i, j)),
        scratch_shapes=[pltpu.VMEM((tm, tn), jnp.float32)],
        compiler_params=pltpu.CompilerParams(
            dimension_semantics=("parallel", "parallel", "arbitrary"),
            vmem_limit_bytes=_VMEM_LIMIT),
    )(x, w, b2)


# ----------------------------------------------------------------------------
# Fused dense + residual add + LayerNorm epilogue:
#   y = LayerNorm((x @ w + b) + r) * g + beta
# ----------------------------------------------------------------------------

def _dense_ln_nok_kernel(x_ref, w_ref, b_ref, r_ref, g_ref, bb_ref, o_ref,
                         *, eps):
    h = jnp.dot(x_ref[...], w_ref[...], preferred_element_type=jnp.float32)
    h = h + b_ref[...] + r_ref[...].astype(jnp.float32)
    mu = jnp.mean(h, axis=-1, keepdims=True)
    var = jnp.mean(jnp.square(h - mu), axis=-1, keepdims=True)
    y = (h - mu) * jax.lax.rsqrt(var + eps) * g_ref[...] + bb_ref[...]
    o_ref[...] = y.astype(o_ref.dtype)


def _dense_ln_acc_kernel(x_ref, w_ref, b_ref, r_ref, g_ref, bb_ref, o_ref,
                         acc_ref, *, eps):
    @pl.when(pl.program_id(1) == 0)
    def _():
        acc_ref[...] = jnp.zeros_like(acc_ref)

    acc_ref[...] += jnp.dot(x_ref[...], w_ref[...],
                            preferred_element_type=jnp.float32)

    @pl.when(pl.program_id(1) == pl.num_programs(1) - 1)
    def _():
        h = acc_ref[...] + b_ref[...] + r_ref[...].astype(jnp.float32)
        mu = jnp.mean(h, axis=-1, keepdims=True)
        var = jnp.mean(jnp.square(h - mu), axis=-1, keepdims=True)
        y = (h - mu) * jax.lax.rsqrt(var + eps) * g_ref[...] + bb_ref[...]
        o_ref[...] = y.astype(o_ref.dtype)


def dense_add_layernorm(x, w, b, r, g, beta, eps=1e-12, out_dtype=jnp.bfloat16):
    M, K = x.shape
    K2, N = w.shape
    assert K == K2 and r.shape == (M, N)
    tm = _tile(M, _TM, 16)
    tk = _tile(K, _TK, 128)
    b2 = b.reshape(1, N).astype(jnp.float32)
    g2 = g.reshape(1, N).astype(jnp.float32)
    bb2 = beta.reshape(1, N).astype(jnp.float32)

    if tk == K:                      # e.g. wo projection (K = hidden)
        return pl.pallas_call(
            functools.partial(_dense_ln_nok_kernel, eps=eps),
            out_shape=jax.ShapeDtypeStruct((M, N), out_dtype),
            grid=(M // tm,),
            in_specs=[
                pl.BlockSpec((tm, K), lambda i: (i, 0)),
                pl.BlockSpec((K, N), lambda i: (0, 0)),
                pl.BlockSpec((1, N), lambda i: (0, 0)),
                pl.BlockSpec((tm, N), lambda i: (i, 0)),
                pl.BlockSpec((1, N), lambda i: (0, 0)),
                pl.BlockSpec((1, N), lambda i: (0, 0)),
            ],
            out_specs=pl.BlockSpec((tm, N), lambda i: (i, 0)),
            compiler_params=pltpu.CompilerParams(
                dimension_semantics=("parallel",),
                vmem_limit_bytes=_VMEM_LIMIT),
        )(x, w, b2, r, g2, bb2)

    return pl.pallas_call(           # e.g. wp projection (K = intermediate)
        functools.partial(_dense_ln_acc_kernel, eps=eps),
        out_shape=jax.ShapeDtypeStruct((M, N), out_dtype),
        grid=(M // tm, K // tk),
        in_specs=[
            pl.BlockSpec((tm, tk), lambda i, k: (i, k)),
            pl.BlockSpec((tk, N), lambda i, k: (k, 0)),
            pl.BlockSpec((1, N), lambda i, k: (0, 0)),
            pl.BlockSpec((tm, N), lambda i, k: (i, 0)),
            pl.BlockSpec((1, N), lambda i, k: (0, 0)),
            pl.BlockSpec((1, N), lambda i, k: (0, 0)),
        ],
        out_specs=pl.BlockSpec((tm, N), lambda i, k: (i, 0)),
        scratch_shapes=[pltpu.VMEM((tm, N), jnp.float32)],
        compiler_params=pltpu.CompilerParams(
            dimension_semantics=("parallel", "arbitrary"),
            vmem_limit_bytes=_VMEM_LIMIT),
    )(x, w, b2, r, g2, bb2)


# ----------------------------------------------------------------------------
# Fused embedding-sum + LayerNorm (row-tiled):  y = LN(a + b) * g + beta
# ----------------------------------------------------------------------------

def _add_ln_kernel(a_ref, b_ref, g_ref, bb_ref, o_ref, *, eps):
    h = a_ref[...].astype(jnp.float32) + b_ref[...].astype(jnp.float32)
    mu = jnp.mean(h, axis=-1, keepdims=True)
    var = jnp.mean(jnp.square(h - mu), axis=-1, keepdims=True)
    y = (h - mu) * jax.lax.rsqrt(var + eps) * g_ref[...] + bb_ref[...]
    o_ref[...] = y.astype(o_ref.dtype)


def add_layernorm(a, b, g, beta, eps=1e-12, out_dtype=jnp.bfloat16):
    M, N = a.shape
    tm = _tile(M, _TM, 16)
    return pl.pallas_call(
        functools.partial(_add_ln_kernel, eps=eps),
        out_shape=jax.ShapeDtypeStruct((M, N), out_dtype),
        grid=(M // tm,),
        in_specs=[
            pl.BlockSpec((tm, N), lambda i: (i, 0)),
            pl.BlockSpec((tm, N), lambda i: (i, 0)),
            pl.BlockSpec((1, N), lambda i: (0, 0)),
            pl.BlockSpec((1, N), lambda i: (0, 0)),
        ],
        out_specs=pl.BlockSpec((tm, N), lambda i: (i, 0)),
        compiler_params=pltpu.CompilerParams(
            dimension_semantics=("parallel",)),
    )(a, b, g.reshape(1, N).astype(jnp.float32),
      beta.reshape(1, N).astype(jnp.float32))


# ----------------------------------------------------------------------------
# Attention on the fused (B, S, 3H) QKV layout.
#
# Grid = (B, num_head_groups).  Each grid step receives 128-lane-wide,
# BlockSpec-pipelined Q / K / V head-group slabs (group = 2 heads when
# 2*D is lane-aligned, which covers BERT-base D=64) and stores one
# lane-dense (S, group_width) output block.  1/sqrt(D) is pre-folded into
# the Q weights/bias at init time, so no in-kernel scaling.
#
# TODO(synk): add a query-tile axis if S ever exceeds ~1024 ((S,S) f32
# scores would blow VMEM on v7x); full K/V rows stay resident here.
# ----------------------------------------------------------------------------

def _attn_kernel(q_ref, k_ref, v_ref, m_ref, o_ref, *, g, D):
    mask = m_ref[0]                                    # (1, S) additive, f32
    ctx = []
    for h in range(g):                                 # g is small (2)
        q = q_ref[0, :, h * D:(h + 1) * D]             # (S, D) bf16
        k = k_ref[0, :, h * D:(h + 1) * D]
        v = v_ref[0, :, h * D:(h + 1) * D]
        s = jax.lax.dot_general(q, k, (((1,), (1,)), ((), ())),
                                preferred_element_type=jnp.float32)
        s = s + mask                                   # masked softmax in f32
        s = s - jnp.max(s, axis=-1, keepdims=True)
        p = jnp.exp(s)
        p = p * pl.reciprocal(jnp.sum(p, axis=-1, keepdims=True), approx=True)
        ctx.append(jnp.dot(p.astype(v.dtype), v,
                           preferred_element_type=jnp.float32))
    # Single lane-dense (S, g*D) store for the whole head group.
    o_ref[0] = jnp.concatenate(ctx, axis=-1).astype(o_ref.dtype)


def attention(qkv, mask, nH, D):
    B, S, H3 = qkv.shape
    H = H3 // 3
    assert H == nH * D
    # Head-group size: pairs when 2*D is 128-lane aligned (BERT-base D=64),
    # otherwise all heads in one group.
    if nH % 2 == 0 and (2 * D) % 128 == 0:
        g = 2
    else:
        g = nH   # TODO(synk): non-128-aligned head widths use one group/row
    G = nH // g                                        # number of head groups
    P = g * D                                          # group lane width

    return pl.pallas_call(
        functools.partial(_attn_kernel, g=g, D=D),
        out_shape=jax.ShapeDtypeStruct((B, S, H), jnp.bfloat16),
        grid=(B, G),
        in_specs=[
            pl.BlockSpec((1, S, P), lambda b, p: (b, 0, p)),           # Q slab
            pl.BlockSpec((1, S, P), lambda b, p: (b, 0, G + p)),       # K slab
            pl.BlockSpec((1, S, P), lambda b, p: (b, 0, 2 * G + p)),   # V slab
            pl.BlockSpec((1, 1, S), lambda b, p: (b, 0, 0)),           # mask
        ],
        out_specs=pl.BlockSpec((1, S, P), lambda b, p: (b, 0, p)),
        compiler_params=pltpu.CompilerParams(
            dimension_semantics=("parallel", "parallel")),
    )(qkv, qkv, qkv, mask)


# ----------------------------------------------------------------------------
# Parameters (deterministic synthetic init; shapes follow BERT's __init__)
# ----------------------------------------------------------------------------

def init_params(key, *, vocab, hidden, layers, heads, inter, max_pos,
                type_vocab):
    keys = iter(jax.random.split(key, 8 + 8 * layers))

    def nrm(shape):
        return (0.02 * jax.random.normal(next(keys), shape)).astype(jnp.float32)

    def zeros(n):
        return jnp.zeros((n,), jnp.float32)

    def ones(n):
        return jnp.ones((n,), jnp.float32)

    D = hidden // heads
    scale = 1.0 / math.sqrt(D)

    params = {
        "word_emb": nrm((vocab, hidden)),
        "pos_emb": nrm((max_pos, hidden)),
        "type_emb": nrm((type_vocab, hidden)),
        "emb_ln_g": ones(hidden), "emb_ln_b": zeros(hidden),
        "layers": [],
        "pool_w": nrm((hidden, hidden)).astype(jnp.bfloat16),
        "pool_b": zeros(hidden),
        # the Bert module's own head: nn.Linear(enc_dim, 1)
        "dense_w": nrm((hidden, 1)), "dense_b": zeros(1),
    }
    for _ in range(layers):
        wq, wk, wv = (nrm((hidden, hidden)), nrm((hidden, hidden)),
                      nrm((hidden, hidden)))
        bq, bk, bv = zeros(hidden), zeros(hidden), zeros(hidden)
        # Fuse Q|K|V into one (H, 3H) weight; fold 1/sqrt(D) into the Q part.
        wqkv = jnp.concatenate([wq * scale, wk, wv], axis=1).astype(jnp.bfloat16)
        bqkv = jnp.concatenate([bq * scale, bk, bv], axis=0)
        params["layers"].append({
            "wqkv": wqkv, "bqkv": bqkv,
            "wo": nrm((hidden, hidden)).astype(jnp.bfloat16), "bo": zeros(hidden),
            "ln1_g": ones(hidden), "ln1_b": zeros(hidden),
            "wi": nrm((hidden, inter)).astype(jnp.bfloat16), "bi": zeros(inter),
            "wp": nrm((inter, hidden)).astype(jnp.bfloat16), "bp": zeros(hidden),
            "ln2_g": ones(hidden), "ln2_b": zeros(hidden),
        })
    return params


# ----------------------------------------------------------------------------
# Forward pass (glue in JAX, hot paths in Pallas; ~4 pallas_calls per layer)
# ----------------------------------------------------------------------------

def bert_encoder(params, input_ids, attention_mask, token_type_ids, cfg):
    B, S = input_ids.shape
    H, nH = cfg["hidden"], cfg["heads"]
    D = H // nH

    # Embedding gathers stay in JAX (data-dependent); the position add fuses
    # with the word gather in XLA; the type add + LayerNorm are one Pallas
    # kernel (no separate (B*S,H) sum materialization).
    word_pos = (jnp.take(params["word_emb"], input_ids, axis=0)
                + params["pos_emb"][:S][None, :, :])                  # (B,S,H)
    typ = jnp.take(params["type_emb"], token_type_ids, axis=0)        # (B,S,H)
    h = add_layernorm(word_pos.reshape(B * S, H), typ.reshape(B * S, H),
                      params["emb_ln_g"], params["emb_ln_b"])         # bf16

    # Additive attention mask, (B, 1, S), kept in f32.
    amask = ((1.0 - attention_mask.astype(jnp.float32)) * -10000.0)[:, None, :]

    for lp in params["layers"]:
        # Fused QKV projection: one (B*S, H) x (H, 3H) matmul.
        qkv = dense(h, lp["wqkv"], lp["bqkv"])                        # (B*S,3H)
        ctx = attention(qkv.reshape(B, S, 3 * H), amask, nH, D)       # (B,S,H)
        ctx = ctx.reshape(B * S, H)

        # Output projection fused with residual add + LayerNorm (K collapses).
        h = dense_add_layernorm(ctx, lp["wo"], lp["bo"], h,
                                lp["ln1_g"], lp["ln1_b"])

        # FFN: matmul+GELU, then matmul fused with residual add + LayerNorm.
        ffn = dense(h, lp["wi"], lp["bi"], act="gelu")
        h = dense_add_layernorm(ffn, lp["wp"], lp["bp"], h,
                                lp["ln2_g"], lp["ln2_b"])

    seq_out = h.reshape(B, S, H)
    cls = seq_out[:, 0, :]                                            # (B,H)
    pooled = dense(cls, params["pool_w"], params["pool_b"], act="tanh",
                   out_dtype=jnp.float32)
    return seq_out, pooled


def bert_apply(params, input_ids, attention_mask=None, token_type_ids=None,
               raw_score=None, cfg=None):
    """Mirrors Bert.forward: returns (score, features)."""
    if attention_mask is None:
        attention_mask = jnp.ones_like(input_ids)
    if token_type_ids is None:
        token_type_ids = jnp.zeros_like(input_ids)

    _, features = bert_encoder(params, input_ids, attention_mask,
                               token_type_ids, cfg)                   # (B,H) f32
    # N=1 head: negligible work, keep it in plain JAX (no pallas_call launch).
    score = (features @ params["dense_w"] + params["dense_b"])[:, 0]  # (B,)
    if raw_score is not None:
        features = jnp.concatenate([features, raw_score[:, None]], axis=1)
    return score, features


# ----------------------------------------------------------------------------
# Demo
# ----------------------------------------------------------------------------

if __name__ == "__main__":
    # Small but layout-realistic config: D=64 per head so the attention
    # kernel exercises the 128-lane head-pair path used at BERT-base scale.
    cfg = dict(vocab=128, hidden=256, layers=2, heads=4, inter=512,
               max_pos=32, type_vocab=2)
    B, S = 2, 8

    key = jax.random.PRNGKey(0)
    pkey, ikey, rkey = jax.random.split(key, 3)

    params = init_params(pkey, **cfg)
    input_ids = jax.random.randint(ikey, (B, S), 0, cfg["vocab"], dtype=jnp.int32)
    attention_mask = jnp.ones((B, S), jnp.int32).at[1, 6:].set(0)
    token_type_ids = jnp.zeros((B, S), jnp.int32).at[:, 4:].set(1)
    raw_score = jax.random.normal(rkey, (B,), jnp.float32)

    score, features = bert_apply(params, input_ids, attention_mask,
                                 token_type_ids, raw_score, cfg=cfg)
    jax.block_until_ready((score, features))

    assert score.shape == (B,)
    assert features.shape == (B, cfg["hidden"] + 1)
    assert jnp.all(jnp.isfinite(score)) and jnp.all(jnp.isfinite(features))
    print("KERNEL_OK")
</pallas_src>

<mosaic_0001>
module attributes {stable_mosaic.version = 11 : i64} {
  func.func @_add_ln_kernel(%arg0: i32, %arg1: memref<16x256xf32, #tpu.memory_space<vmem>>, %arg2: memref<16x256xf32, #tpu.memory_space<vmem>>, %arg3: memref<1x256xf32, #tpu.memory_space<vmem>>, %arg4: memref<1x256xf32, #tpu.memory_space<vmem>>, %arg5: memref<16x256xbf16, #tpu.memory_space<vmem>>) attributes {dimension_semantics = [#tpu.dimension_semantics<parallel>], iteration_bounds = array<i64: 1>, scalar_prefetch = 0 : i64, scratch_operands = 0 : i64, tpu.core_type = #tpu.core_type<tc>, window_params = [{transform_indices = @transform_0, window_bounds = array<i64: 16, 256>}, {transform_indices = @transform_1, window_bounds = array<i64: 16, 256>}, {pipeline_mode = #tpu.pipeline_mode<synchronous>, transform_indices = @transform_2, window_bounds = array<i64: 1, 256>}, {pipeline_mode = #tpu.pipeline_mode<synchronous>, transform_indices = @transform_3, window_bounds = array<i64: 1, 256>}, {transform_indices = @transform_4, window_bounds = array<i64: 16, 256>}]} {
    %c0 = arith.constant 0 : index
    %c0_0 = arith.constant 0 : index
    %0 = vector.load %arg1[%c0, %c0_0] : memref<16x256xf32, #tpu.memory_space<vmem>>, vector<16x256xf32>
    %c0_1 = arith.constant 0 : index
    %c0_2 = arith.constant 0 : index
    %1 = vector.load %arg2[%c0_1, %c0_2] : memref<16x256xf32, #tpu.memory_space<vmem>>, vector<16x256xf32>
    %2 = arith.addf %0, %1 : vector<16x256xf32>
    %cst = arith.constant dense<0.000000e+00> : vector<16xf32>
    %3 = vector.multi_reduction <add>, %2, %cst [1] : vector<16x256xf32> to vector<16xf32>
    %4 = vector.shape_cast %3 : vector<16xf32> to vector<16x1xf32>
    %cst_3 = arith.constant 2.560000e+02 : f32
    %5 = vector.broadcast %cst_3 : f32 to vector<16x1xf32>
    %6 = arith.divf %4, %5 : vector<16x1xf32>
    %7 = vector.broadcast %6 : vector<16x1xf32> to vector<16x256xf32>
    %8 = arith.subf %2, %7 : vector<16x256xf32>
    %9 = arith.mulf %8, %8 : vector<16x256xf32>
    %cst_4 = arith.constant dense<0.000000e+00> : vector<16xf32>
    %10 = vector.multi_reduction <add>, %9, %cst_4 [1] : vector<16x256xf32> to vector<16xf32>
    %11 = vector.shape_cast %10 : vector<16xf32> to vector<16x1xf32>
    %cst_5 = arith.constant 2.560000e+02 : f32
    %12 = vector.broadcast %cst_5 : f32 to vector<16x1xf32>
    %13 = arith.divf %11, %12 : vector<16x1xf32>
    %14 = vector.broadcast %6 : vector<16x1xf32> to vector<16x256xf32>
    %15 = arith.subf %2, %14 : vector<16x256xf32>
    %cst_6 = arith.constant 9.99999996E-13 : f32
    %16 = vector.broadcast %cst_6 : f32 to vector<16x1xf32>
    %17 = arith.addf %13, %16 : vector<16x1xf32>
    %18 = math.rsqrt %17 : vector<16x1xf32>
    %19 = vector.broadcast %18 : vector<16x1xf32> to vector<16x256xf32>
    %20 = arith.mulf %15, %19 : vector<16x256xf32>
    %c0_7 = arith.constant 0 : index
    %c0_8 = arith.constant 0 : index
    %21 = vector.load %arg3[%c0_7, %c0_8] : memref<1x256xf32, #tpu.memory_space<vmem>>, vector<1x256xf32>
    %22 = vector.broadcast %21 : vector<1x256xf32> to vector<16x256xf32>
    %23 = arith.mulf %20, %22 : vector<16x256xf32>
    %c0_9 = arith.constant 0 : index
    %c0_10 = arith.constant 0 : index
    %24 = vector.load %arg4[%c0_9, %c0_10] : memref<1x256xf32, #tpu.memory_space<vmem>>, vector<1x256xf32>
    %25 = vector.broadcast %24 : vector<1x256xf32> to vector<16x256xf32>
    %26 = arith.addf %23, %25 : vector<16x256xf32>
    %27 = arith.truncf %26 : vector<16x256xf32> to vector<16x256xbf16>
    %c0_11 = arith.constant 0 : index
    %c0_12 = arith.constant 0 : index
    %28 = vector.load %arg5[%c0_11, %c0_12] : memref<16x256xbf16, #tpu.memory_space<vmem>>, vector<16x256xbf16>
    tpu.vector_store %arg5[%c0_11, %c0_12], %27 {strides = array<i32>} : memref<16x256xbf16, #tpu.memory_space<vmem>>, vector<16x256xbf16>,
    return
  }
  func.func @transform_0(%arg0: i32) -> (i32, i32) {
    %c0_i32 = arith.constant 0 : i32
    %c0_i32_0 = arith.constant 0 : i32
    return %arg0, %c0_i32 : i32, i32
  }
  func.func @transform_1(%arg0: i32) -> (i32, i32) {
    %c0_i32 = arith.constant 0 : i32
    %c0_i32_0 = arith.constant 0 : i32
    return %arg0, %c0_i32 : i32, i32
  }
  func.func @transform_2(%arg0: i32) -> (i32, i32) {
    %c0_i32 = arith.constant 0 : i32
    %c0_i32_0 = arith.constant 0 : i32
    %c0_i32_1 = arith.constant 0 : i32
    return %c0_i32, %c0_i32_0 : i32, i32
  }
  func.func @transform_3(%arg0: i32) -> (i32, i32) {
    %c0_i32 = arith.constant 0 : i32
    %c0_i32_0 = arith.constant 0 : i32
    %c0_i32_1 = arith.constant 0 : i32
    return %c0_i32, %c0_i32_0 : i32, i32
  }
  func.func @transform_4(%arg0: i32) -> (i32, i32) {
    %c0_i32 = arith.constant 0 : i32
    %c0_i32_0 = arith.constant 0 : i32
    return %arg0, %c0_i32 : i32, i32
  }
}

</mosaic_0001>

<bundles_post_ra>
// kernel: tpu_custom_call.1
= control target key start
LH: loop header
LB: loop body
LE: loop exit
PB: predicated region body
PF: predicated region fallthrough
CT: control target
= control target key end

     0   :  { %9 = vsyncpa [#allocation3], 0  ;;  %s316_s0 = inlined_call_operand.hbm [shape: f32[16,256], index: 0, kind: input, shape index: {}]   ;;  %s317_s1 = inlined_call_operand.hbm [shape: f32[16,256], index: 1, kind: input, shape index: {}]   ;;  %s318_s2 = inlined_call_operand.vmem [shape: f32[1,256], index: 2, kind: input, shape index: {}]   ;;  %s319_s3 = inlined_call_operand.vmem [shape: f32[1,256], index: 3, kind: input, shape index: {}]   ;;  %s320_s4 = inlined_call_operand.hbm [shape: bf16[16,256], index: 4, kind: output, shape index: {}]  }
   0x1   :  { %10 = vsyncpa [#allocation6], 0 }
   0x2   :  { %11 = vsyncpa [#allocation4], 0  ;;  %s242_s15 = smov [#allocation2]   ;;  %s170_s19 = scalar_lea.hbm %s316_s0, 512 }
   0x3   :  { %s17_s16 = sshll.u32 %s242_s15, 4  ;;  %p171_p0 = scmp.ne.s32.totalorder %s316_s0, %s170_s19  ;;  %s18_s16 = int_to_ptr.vmem [resolvable:$true] %s17_s16 }
   0x4   :  { %p174_p1 = scmp.lt.u32.totalorder %s170_s19, %s316_s0 }
   0x6   :  { %p176_p2 = pnand %p174_p1, %p171_p0 }
   0x8   :  { %179 = shalt.err (!%p176_p2)
}
   0x9   :  { %s180_s24 = scalar_lea.vmem %s18_s16, 512  ;;  %p185_p4 = scmp.lt.s32.totalorder %s18_s16, %s18_s16 }
   0xa   :  { %p181_p3 = scmp.ne.s32.totalorder %s18_s16, %s180_s24  ;;  %p186_p5 = scmp.lt.s32.totalorder %s180_s24, %s180_s24 }
   0xc   :  { %p187_p6 = por %p186_p5, %p185_p4 }
   0xe   :  { %p188_p7 = pnand %p187_p6, %p181_p3 }
  0x10   :  { %191 = shalt.err (!%p188_p7)
}
  0x11   :  { %s243_s25 = smov 256   ;;  %s244_s26 = smov 16  }
  0x12   :  { %23 = dma.hbm_to_vmem [thread:$0]  %s316_s0, 512, %s18_s16, [#allocation3], %s243_s25, %s243_s25, %s244_s26  }
  0x13   :  { %s245_s29 = smov [#allocation5]   ;;  %s192_s7 = scalar_lea.hbm %s317_s1, 512 }
  0x14   :  { %s29_s30 = sshll.u32 %s245_s29, 4  ;;  %p193_p8 = scmp.ne.s32.totalorder %s317_s1, %s192_s7  ;;  %s30_s30 = int_to_ptr.vmem [resolvable:$true] %s29_s30 }
  0x15   :  { %p196_p9 = scmp.lt.u32.totalorder %s192_s7, %s317_s1 }
  0x17   :  { %p198_p10 = pnand %p196_p9, %p193_p8 }
  0x19   :  { %201 = shalt.err (!%p198_p10)
}
  0x1a   :  { %s202_s12 = scalar_lea.vmem %s30_s30, 512  ;;  %p207_p12 = scmp.lt.s32.totalorder %s30_s30, %s30_s30 }
  0x1b   :  { %p203_p11 = scmp.ne.s32.totalorder %s30_s30, %s202_s12  ;;  %p208_p13 = scmp.lt.s32.totalorder %s202_s12, %s202_s12 }
  0x1d   :  { %p209_p0 = por %p208_p13, %p207_p12 }
  0x1f   :  { %p210_p1 = pnand %p209_p0, %p203_p11 }
  0x21   :  { %213 = shalt.err (!%p210_p1)
}
  0x22   :  { %35 = dma.hbm_to_vmem [thread:$0]  %s317_s1, 512, %s30_s30, [#allocation6], %s243_s25, %s243_s25, %s244_s26  }
  0x23   :  { %236 = dma.done.wait [#allocation3], 512  }
  0x24   :  { %237 = vsyncadd [#allocation3], 4294966784 }
  0x25   :  { %238 = dma.done.wait [#allocation6], 512  }
  0x26   :  { %239 = vsyncadd [#allocation6], 4294966784  ;;  %v46_v0 = vld [vmem:[#allocation2] sm:$0xff]  ;;  %v47_v1 = vld [vmem:[#allocation2 + $0x8] sm:$0xff]  ;;  %v93_v30 = vlaneseq }
  0x27   :  { %v50_v2 = vld [vmem:[#allocation5] sm:$0xff]  ;;  %v51_v3 = vld [vmem:[#allocation5 + $0x8] sm:$0xff]  ;;  %v48_v5 = vld [vmem:[#allocation2 + $0x10] sm:$0xff] }
  0x28   :  { %v54_v4 = vadd.f32 %v50_v2, %v46_v0  ;;  %v49_v6 = vld [vmem:[#allocation2 + $0x18] sm:$0xff]  ;;  %v55_v7 = vadd.f32 %v51_v3, %v47_v1  ;;  %v52_v8 = vld [vmem:[#allocation5 + $0x10] sm:$0xff]  ;;  %v94_v34 = vshrl.u32 %v93_v30, 7  ;;  %v91_v38 = vld [vmem:[%s318_s2] sm:$0x3]  ;;  %s246_s2 = smov [#allocation7]  }
  0x29   :  { %v53_v9 = vld [vmem:[#allocation5 + $0x18] sm:$0xff]  ;;  %v56_v10 = vadd.f32 %v52_v8, %v48_v5  ;;  %v107_v39 = vld [vmem:[%s319_s3] sm:$0x3]  ;;  %s142_s17 = sshll.u32 %s246_s2, 4  ;;  %s143_s17 = int_to_ptr.vmem [resolvable:$true] %s142_s17 }
  0x2a   :  { %v57_v11 = vadd.f32 %v53_v9, %v49_v6  ;;  %v58_v12 = vadd.f32 %v55_v7, %v54_v4  ;;  %v95_v36 = vsub.s32 0, %v94_v34  ;;  %v99_v37 = vsub.s32 1, %v94_v34  ;;  %s214_s3 = scalar_lea.vmem %s143_s17, 256  ;;  %p219_p3 = scmp.lt.s32.totalorder %s143_s17, %s143_s17 }
  0x2b   :  { %p215_p2 = scmp.ne.s32.totalorder %s143_s17, %s214_s3  ;;  %p220_p4 = scmp.lt.s32.totalorder %s214_s3, %s214_s3 }
  0x2c   :  { %59 = vadd.xlane.f32.xlu0 %v58_v12  ;;  %v61_v13 = vadd.f32 %v57_v11, %v56_v10  ;;  %v96_v40 = vrot.slane %v91_v38, %v95_v36  ;;  %v100_v41 = vrot.slane %v91_v38, %v99_v37  ;;  %v112_v45 = vrot.slane %v107_v39, %v95_v36 }
  0x2d   :  { %v116_v46 = vrot.slane %v107_v39, %v99_v37  ;;  %p221_p5 = por %p220_p4, %p219_p3 }
  0x2f   :  { %p222_p6 = pnand %p221_p5, %p215_p2 }
  0x30   :  { %62 = vadd.xlane.f32.xlu0 %v61_v13 }
  0xb9   :  { %v60_v14 = vpop.xlane.xlu0 %59 }
  0xba   :  { %v65_v15 = vmul.f32 0.00390625, %v60_v14 }
  0xbc   :  { %v67_v16 = vsub.f32 %v54_v4, %v65_v15  ;;  %v68_v17 = vsub.f32 %v55_v7, %v65_v15 }
  0xbd   :  { %v63_v18 = vpop.xlane.xlu0 %62 }
  0xbe   :  { %v66_v19 = vmul.f32 0.00390625, %v63_v18  ;;  %v71_v20 = vmul.f32 %v67_v16, %v67_v16  ;;  %v72_v21 = vmul.f32 %v68_v17, %v68_v17 }
  0xc0   :  { %v69_v22 = vsub.f32 %v56_v10, %v66_v19  ;;  %v70_v23 = vsub.f32 %v57_v11, %v66_v19  ;;  %v75_v24 = vadd.f32 %v72_v21, %v71_v20 }
  0xc2   :  { %76 = vadd.xlane.f32.xlu1 %v75_v24  ;;  %v73_v25 = vmul.f32 %v69_v22, %v69_v22  ;;  %v74_v26 = vmul.f32 %v70_v23, %v70_v23 }
  0xc4   :  { %v78_v27 = vadd.f32 %v74_v26, %v73_v25 }
  0xc6   :  { %79 = vadd.xlane.f32.xlu1 %v78_v27 }
 0x14f   :  { %v77_v28 = vpop.xlane.xlu1 %76 }
 0x150   :  { %v81_v29 = vmul.f32 0.00390625, %v77_v28 }
 0x152   :  { %v83_v31 = vadd.f32 1e-12, %v81_v29 }
 0x153   :  { %v80_v32 = vpop.xlane.xlu1 %79 }
 0x154   :  { %166 = vrsqrt.f32 %v83_v31  ;;  %v82_v33 = vmul.f32 0.00390625, %v80_v32 }
 0x156   :  { %v84_v35 = vadd.f32 1e-12, %v82_v33 }
 0x158   :  { %168 = vrsqrt.f32 %v84_v35 }
 0x15e   :  { %v167_v42 = vpop.eup %166 }
 0x15f   :  { %v87_v43 = vmul.f32 %v167_v42, %v67_v16  ;;  %v88_v44 = vmul.f32 %v167_v42, %v68_v17 }
 0x161   :  { %v103_v47 = vmul.f32 %v96_v40, %v87_v43  ;;  %v104_v48 = vmul.f32 %v100_v41, %v88_v44 }
 0x162   :  { %v169_v49 = vpop.eup %168 }
 0x163   :  { %v89_v50 = vmul.f32 %v169_v49, %v69_v22  ;;  %v90_v51 = vmul.f32 %v169_v49, %v70_v23  ;;  %v119_v52 = vadd.f32 %v112_v45, %v103_v47  ;;  %v120_v53 = vadd.f32 %v116_v46, %v104_v48 }
 0x165   :  { %v105_v54 = vmul.f32 %v96_v40, %v89_v50  ;;  %v106_v55 = vmul.f32 %v100_v41, %v90_v51  ;;  %v157_v56 = vpack.c.bf16 %v120_v53, %v119_v52 }
 0x167   :  { %v121_v57 = vadd.f32 %v112_v45, %v105_v54  ;;  %v122_v58 = vadd.f32 %v116_v46, %v106_v55  ;;  %135 = vst [vmem:[#allocation7] sm:$0xff] %v157_v56 }
 0x169   :  { %v158_v59 = vpack.c.bf16 %v122_v58, %v121_v57 }
 0x16b   :  { %136 = vst [vmem:[#allocation7 + $0x8] sm:$0xff] %v158_v59 }
 0x16c   :  { %225 = shalt.err (!%p222_p6)
}
 0x16d   :  { %s226_s20 = scalar_lea.hbm %s320_s4, 256 }
 0x16e   :  { %p227_p7 = scmp.ne.s32.totalorder %s320_s4, %s226_s20  ;;  %p230_p8 = scmp.lt.u32.totalorder %s226_s20, %s320_s4 }
 0x170   :  { %p232_p9 = pnand %p230_p8, %p227_p7 }
 0x172   :  { %235 = shalt.err (!%p232_p9)
}
 0x173   :  { %s247_s25 = smov 128   ;;  %s248_s26 = smov 8  }
 0x174   :  { %148 = dma.vmem_to_hbm [thread:$0]  %s143_s17, 256, %s320_s4, [#allocation4], %s247_s25, %s247_s25, %s248_s26  }
 0x175   :  { %240 = dma.done.wait [#allocation4], 256  }
 0x176   :  { %241 = vsyncadd [#allocation4], 4294967040 }
 0x177   :  { %152 = vsyncpa [#allocation3], 1 }
 0x178   :  { %153 = vsyncpa [#allocation6], 1 }
 0x179   :  { %154 = vsyncpa [#allocation4], 1 }

</bundles_post_ra>
